<compile_context>
chip_gen: v6e
topology: v6e:2x2x1
jax: 0.10.0
libtpu: 0.0.40
codegen_flags: <defaults>
</compile_context>

<pallas_src>
import math

import jax
import jax.numpy as jnp
from jax import lax
from jax.experimental import pallas as pl
from jax.experimental.pallas import tpu as pltpu

_LANE = 128
_SUBLANE = 8


def _round_up(x, m):
    return (x + m - 1) // m * m


def _classifier_kernel(x_ref, w1_ref, b1_ref, gamma_ref, beta_ref,
                       w2_ref, b2_ref, o_ref):
    # ---- Linear 1: bf16 operands on the MXU, f32 accumulation ----
    h = jnp.dot(x_ref[...], w1_ref[...],
                preferred_element_type=jnp.float32) + b1_ref[...]

    # ---- Dropout: identity (inference mode) ----

    # ---- GELU (exact, erf-based; erf goes to the EUP slot) ----
    h = 0.5 * h * (1.0 + lax.erf(h * jnp.float32(1.0 / math.sqrt(2.0))))

    # ---- BertLayerNorm over last dim, eps=1e-12, biased variance (f32) ----
    u = jnp.mean(h, axis=-1, keepdims=True)
    s = jnp.mean((h - u) * (h - u), axis=-1, keepdims=True)
    hn = (h - u) * lax.rsqrt(s + jnp.float32(1e-12))
    hn = hn * gamma_ref[...] + beta_ref[...]

    # ---- Linear 2: cast back to bf16 for the MXU, accumulate f32 ----
    out = jnp.dot(hn.astype(w2_ref.dtype), w2_ref[...],
                  preferred_element_type=jnp.float32) + b2_ref[...]
    o_ref[...] = out.astype(o_ref.dtype)


def simple_classifier(x, w1, b1, gamma, beta, w2, b2, *,
                      block_b=None, mxu_dtype=jnp.bfloat16):
    """x: [B, in_dim] -> [B, out_dim].  Weights stored as [in, out] (transposed vs torch)."""
    B, in_dim = x.shape
    hid_dim = w1.shape[1]
    out_dim = w2.shape[1]
    out_dtype = x.dtype

    # Explicit batch tile (don't default to block_b == B): 256 rows is a good
    # production starting point; small batches become one padded tile.
    if block_b is None:
        block_b = min(256, _round_up(B, _SUBLANE))
    block_b = max(_SUBLANE, _round_up(block_b, _SUBLANE))
    b_pad = _round_up(B, block_b)

    # Lane-dense output: pad out_dim up to a 128 multiple with zero columns of
    # W2/b2; the extra columns are sliced off outside the kernel.
    out_dim_p = _round_up(out_dim, _LANE)

    # TODO(synk): hid_dim is deliberately NOT padded -- LayerNorm statistics run
    # over the full last dim, so padding it would require explicit masking.
    # TODO(synk): for weights that outgrow scoped VMEM (v5e 16 MiB default),
    # add a K grid axis over in_dim with an f32 accumulator instead of
    # keeping W1 fully resident.

    xp = x.astype(mxu_dtype)
    if b_pad != B:
        xp = jnp.pad(xp, ((0, b_pad - B), (0, 0)))
    w1c = w1.astype(mxu_dtype)
    w2c = jnp.pad(w2.astype(mxu_dtype), ((0, 0), (0, out_dim_p - out_dim)))
    b1r = b1.reshape(1, hid_dim).astype(jnp.float32)
    gammar = gamma.reshape(1, hid_dim).astype(jnp.float32)
    betar = beta.reshape(1, hid_dim).astype(jnp.float32)
    b2r = jnp.pad(b2.reshape(1, out_dim).astype(jnp.float32),
                  ((0, 0), (0, out_dim_p - out_dim)))

    grid = (b_pad // block_b,)

    # Explicit scoped-VMEM budget: resident weights + double-buffered x/out
    # tiles + f32 intermediates, 2x headroom, capped at v7x's 64 MiB physical.
    w_bytes = jnp.dtype(mxu_dtype).itemsize
    vmem_est = (
        2 * (in_dim * hid_dim + hid_dim * out_dim_p) * w_bytes      # weights (<=2 bufs)
        + 2 * (3 * hid_dim + out_dim_p) * 4                         # biases / LN params
        + 2 * block_b * in_dim * w_bytes                            # x tile (2 buffers)
        + 2 * block_b * out_dim_p * jnp.dtype(out_dtype).itemsize   # out tile (2 buffers)
        + 4 * block_b * hid_dim * 4                                 # f32 temporaries
    )
    vmem_limit = int(min(64 * 1024 * 1024, max(2 * vmem_est, 16 * 1024 * 1024)))

    def call(single_buffer_consts):
        const_kw = {}
        if single_buffer_consts and hasattr(pl, "Buffered"):
            const_kw = dict(pipeline_mode=pl.Buffered(1))

        def const_spec(shape):
            # Grid-invariant operand: constant index_map (no re-DMA across the
            # grid), optionally single-buffered.
            return pl.BlockSpec(shape, lambda i: (0, 0), **const_kw)

        return pl.pallas_call(
            _classifier_kernel,
            out_shape=jax.ShapeDtypeStruct((b_pad, out_dim_p), out_dtype),
            grid_spec=pltpu.PrefetchScalarGridSpec(
                num_scalar_prefetch=0,
                grid=grid,
                in_specs=[
                    pl.BlockSpec((block_b, in_dim), lambda i: (i, 0)),  # x tile
                    const_spec((in_dim, hid_dim)),                      # W1 (resident)
                    const_spec((1, hid_dim)),                           # b1
                    const_spec((1, hid_dim)),                           # LN gamma
                    const_spec((1, hid_dim)),                           # LN beta
                    const_spec((hid_dim, out_dim_p)),                   # W2 (resident)
                    const_spec((1, out_dim_p)),                         # b2
                ],
                out_specs=pl.BlockSpec((block_b, out_dim_p), lambda i: (i, 0)),
            ),
            compiler_params=pltpu.CompilerParams(
                dimension_semantics=("parallel",),
                vmem_limit_bytes=vmem_limit,
            ),
        )(xp, w1c, b1r, gammar, betar, w2c, b2r)

    try:
        out = jax.block_until_ready(call(True))
    except Exception:
        # pl.Buffered(1) on a top-level BlockSpec is not available / accepted
        # on every jax version; fall back to default (double-buffered) consts.
        out = jax.block_until_ready(call(False))

    return out[:B, :out_dim]


def reference(x, w1, b1, gamma, beta, w2, b2, mxu_dtype=jnp.bfloat16):
    """Pure-JAX reference with the same bf16-operand / f32-accumulate policy."""
    h = jnp.dot(x.astype(mxu_dtype), w1.astype(mxu_dtype),
                preferred_element_type=jnp.float32) + b1.reshape(1, -1)
    h = 0.5 * h * (1.0 + lax.erf(h / jnp.sqrt(jnp.float32(2.0))))
    u = jnp.mean(h, axis=-1, keepdims=True)
    s = jnp.mean((h - u) ** 2, axis=-1, keepdims=True)
    hn = (h - u) / jnp.sqrt(s + 1e-12)
    hn = hn * gamma.reshape(1, -1) + beta.reshape(1, -1)
    out = jnp.dot(hn.astype(mxu_dtype), w2.astype(mxu_dtype),
                  preferred_element_type=jnp.float32) + b2.reshape(1, -1)
    return out.astype(x.dtype)


if __name__ == "__main__":
    # Small shapes implied by the module; B=30 exercises the ragged-batch pad.
    B, in_dim, hid_dim, out_dim = 30, 32, 64, 16

    key = jax.random.PRNGKey(0)
    kx, k1, k2, k3, k4 = jax.random.split(key, 5)

    x = jax.random.normal(kx, (B, in_dim), dtype=jnp.float32)
    w1 = jax.random.normal(k1, (in_dim, hid_dim), dtype=jnp.float32) * (1.0 / math.sqrt(in_dim))
    b1 = jax.random.normal(k2, (1, hid_dim), dtype=jnp.float32) * 0.02
    gamma = jnp.ones((1, hid_dim), dtype=jnp.float32)
    beta = jnp.zeros((1, hid_dim), dtype=jnp.float32)
    w2 = jax.random.normal(k3, (hid_dim, out_dim), dtype=jnp.float32) * (1.0 / math.sqrt(hid_dim))
    b2 = jax.random.normal(k4, (1, out_dim), dtype=jnp.float32) * 0.02

    # block_b=8 -> grid=(4,): exercises the pipelined batch tiling at toy size.
    out = simple_classifier(x, w1, b1, gamma, beta, w2, b2, block_b=8)
    out = jax.block_until_ready(out)

    ref = reference(x, w1, b1, gamma, beta, w2, b2)
    assert out.shape == (B, out_dim), out.shape
    assert jnp.allclose(out, ref, atol=2e-3, rtol=2e-3), float(jnp.max(jnp.abs(out - ref)))

    print("KERNEL_OK")
</pallas_src>

<mosaic_0001>
module attributes {stable_mosaic.version = 11 : i64} {
  func.func @_classifier_kernel(%arg0: i32, %arg1: memref<8x32xbf16, #tpu.memory_space<vmem>>, %arg2: memref<32x64xbf16, #tpu.memory_space<vmem>>, %arg3: memref<1x64xf32, #tpu.memory_space<vmem>>, %arg4: memref<1x64xf32, #tpu.memory_space<vmem>>, %arg5: memref<1x64xf32, #tpu.memory_space<vmem>>, %arg6: memref<64x128xbf16, #tpu.memory_space<vmem>>, %arg7: memref<1x128xf32, #tpu.memory_space<vmem>>, %arg8: memref<8x128xf32, #tpu.memory_space<vmem>>) attributes {dimension_semantics = [#tpu.dimension_semantics<parallel>], iteration_bounds = array<i64: 4>, scalar_prefetch = 0 : i64, scratch_operands = 0 : i64, tpu.core_type = #tpu.core_type<tc>, window_params = [{transform_indices = @transform_0, window_bounds = array<i64: 8, 32>}, {pipeline_mode = #tpu.pipeline_mode<synchronous>, transform_indices = @transform_1, window_bounds = array<i64: 32, 64>}, {pipeline_mode = #tpu.pipeline_mode<synchronous>, transform_indices = @transform_2, window_bounds = array<i64: 1, 64>}, {pipeline_mode = #tpu.pipeline_mode<synchronous>, transform_indices = @transform_3, window_bounds = array<i64: 1, 64>}, {pipeline_mode = #tpu.pipeline_mode<synchronous>, transform_indices = @transform_4, window_bounds = array<i64: 1, 64>}, {pipeline_mode = #tpu.pipeline_mode<synchronous>, transform_indices = @transform_5, window_bounds = array<i64: 64, 128>}, {pipeline_mode = #tpu.pipeline_mode<synchronous>, transform_indices = @transform_6, window_bounds = array<i64: 1, 128>}, {transform_indices = @transform_7, window_bounds = array<i64: 8, 128>}]} {
    %c0 = arith.constant 0 : index
    %c0_0 = arith.constant 0 : index
    %0 = vector.load %arg1[%c0, %c0_0] : memref<8x32xbf16, #tpu.memory_space<vmem>>, vector<8x32xbf16>
    %c0_1 = arith.constant 0 : index
    %c0_2 = arith.constant 0 : index
    %1 = vector.load %arg2[%c0_1, %c0_2] : memref<32x64xbf16, #tpu.memory_space<vmem>>, vector<32x64xbf16>
    %cst = arith.constant dense<0.000000e+00> : vector<8x64xf32>
    %2 = tpu.matmul %0, %1, %cst {dimension_numbers = #tpu.dot_dimension_numbers<[1], [0], [0], [1], [0, 0, 1, 1], [], []>} : vector<8x32xbf16>, vector<32x64xbf16>, vector<8x64xf32> -> vector<8x64xf32>
    %c0_3 = arith.constant 0 : index
    %c0_4 = arith.constant 0 : index
    %3 = vector.load %arg3[%c0_3, %c0_4] : memref<1x64xf32, #tpu.memory_space<vmem>>, vector<1x64xf32>
    %4 = vector.broadcast %3 : vector<1x64xf32> to vector<8x64xf32>
    %5 = arith.addf %2, %4 : vector<8x64xf32>
    %cst_5 = arith.constant 5.000000e-01 : f32
    %6 = vector.broadcast %cst_5 : f32 to vector<8x64xf32>
    %7 = arith.mulf %6, %5 : vector<8x64xf32>
    %cst_6 = arith.constant 0.707106769 : f32
    %8 = vector.broadcast %cst_6 : f32 to vector<8x64xf32>
    %9 = arith.mulf %5, %8 : vector<8x64xf32>
    %10 = math.erf %9 : vector<8x64xf32>
    %cst_7 = arith.constant 1.000000e+00 : f32
    %11 = vector.broadcast %cst_7 : f32 to vector<8x64xf32>
    %12 = arith.addf %11, %10 : vector<8x64xf32>
    %13 = arith.mulf %7, %12 : vector<8x64xf32>
    %cst_8 = arith.constant dense<0.000000e+00> : vector<8xf32>
    %14 = vector.multi_reduction <add>, %13, %cst_8 [1] : vector<8x64xf32> to vector<8xf32>
    %15 = vector.shape_cast %14 : vector<8xf32> to vector<8x1xf32>
    %cst_9 = arith.constant 6.400000e+01 : f32
    %16 = vector.broadcast %cst_9 : f32 to vector<8x1xf32>
    %17 = arith.divf %15, %16 : vector<8x1xf32>
    %18 = vector.broadcast %17 : vector<8x1xf32> to vector<8x64xf32>
    %19 = arith.subf %13, %18 : vector<8x64xf32>
    %20 = vector.broadcast %17 : vector<8x1xf32> to vector<8x64xf32>
    %21 = arith.subf %13, %20 : vector<8x64xf32>
    %22 = arith.mulf %19, %21 : vector<8x64xf32>
    %cst_10 = arith.constant dense<0.000000e+00> : vector<8xf32>
    %23 = vector.multi_reduction <add>, %22, %cst_10 [1] : vector<8x64xf32> to vector<8xf32>
    %24 = vector.shape_cast %23 : vector<8xf32> to vector<8x1xf32>
    %cst_11 = arith.constant 6.400000e+01 : f32
    %25 = vector.broadcast %cst_11 : f32 to vector<8x1xf32>
    %26 = arith.divf %24, %25 : vector<8x1xf32>
    %27 = vector.broadcast %17 : vector<8x1xf32> to vector<8x64xf32>
    %28 = arith.subf %13, %27 : vector<8x64xf32>
    %cst_12 = arith.constant 9.99999996E-13 : f32
    %29 = vector.broadcast %cst_12 : f32 to vector<8x1xf32>
    %30 = arith.addf %26, %29 : vector<8x1xf32>
    %31 = math.rsqrt %30 : vector<8x1xf32>
    %32 = vector.broadcast %31 : vector<8x1xf32> to vector<8x64xf32>
    %33 = arith.mulf %28, %32 : vector<8x64xf32>
    %c0_13 = arith.constant 0 : index
    %c0_14 = arith.constant 0 : index
    %34 = vector.load %arg4[%c0_13, %c0_14] : memref<1x64xf32, #tpu.memory_space<vmem>>, vector<1x64xf32>
    %35 = vector.broadcast %34 : vector<1x64xf32> to vector<8x64xf32>
    %36 = arith.mulf %33, %35 : vector<8x64xf32>
    %c0_15 = arith.constant 0 : index
    %c0_16 = arith.constant 0 : index
    %37 = vector.load %arg5[%c0_15, %c0_16] : memref<1x64xf32, #tpu.memory_space<vmem>>, vector<1x64xf32>
    %38 = vector.broadcast %37 : vector<1x64xf32> to vector<8x64xf32>
    %39 = arith.addf %36, %38 : vector<8x64xf32>
    %40 = arith.truncf %39 : vector<8x64xf32> to vector<8x64xbf16>
    %c0_17 = arith.constant 0 : index
    %c0_18 = arith.constant 0 : index
    %41 = vector.load %arg6[%c0_17, %c0_18] : memref<64x128xbf16, #tpu.memory_space<vmem>>, vector<64x128xbf16>
    %cst_19 = arith.constant dense<0.000000e+00> : vector<8x128xf32>
    %42 = tpu.matmul %40, %41, %cst_19 {dimension_numbers = #tpu.dot_dimension_numbers<[1], [0], [0], [1], [0, 0, 1, 1], [], []>} : vector<8x64xbf16>, vector<64x128xbf16>, vector<8x128xf32> -> vector<8x128xf32>
    %c0_20 = arith.constant 0 : index
    %c0_21 = arith.constant 0 : index
    %43 = vector.load %arg7[%c0_20, %c0_21] : memref<1x128xf32, #tpu.memory_space<vmem>>, vector<1x128xf32>
    %44 = vector.broadcast %43 : vector<1x128xf32> to vector<8x128xf32>
    %45 = arith.addf %42, %44 : vector<8x128xf32>
    %c0_22 = arith.constant 0 : index
    %c0_23 = arith.constant 0 : index
    %46 = vector.load %arg8[%c0_22, %c0_23] : memref<8x128xf32, #tpu.memory_space<vmem>>, vector<8x128xf32>
    tpu.vector_store %arg8[%c0_22, %c0_23], %45 {strides = array<i32>} : memref<8x128xf32, #tpu.memory_space<vmem>>, vector<8x128xf32>,
    return
  }
  func.func @transform_0(%arg0: i32) -> (i32, i32) {
    %c0_i32 = arith.constant 0 : i32
    %c0_i32_0 = arith.constant 0 : i32
    return %arg0, %c0_i32 : i32, i32
  }
  func.func @transform_1(%arg0: i32) -> (i32, i32) {
    %c0_i32 = arith.constant 0 : i32
    %c0_i32_0 = arith.constant 0 : i32
    %c0_i32_1 = arith.constant 0 : i32
    return %c0_i32, %c0_i32_0 : i32, i32
  }
  func.func @transform_2(%arg0: i32) -> (i32, i32) {
    %c0_i32 = arith.constant 0 : i32
    %c0_i32_0 = arith.constant 0 : i32
    %c0_i32_1 = arith.constant 0 : i32
    return %c0_i32, %c0_i32_0 : i32, i32
  }
  func.func @transform_3(%arg0: i32) -> (i32, i32) {
    %c0_i32 = arith.constant 0 : i32
    %c0_i32_0 = arith.constant 0 : i32
    %c0_i32_1 = arith.constant 0 : i32
    return %c0_i32, %c0_i32_0 : i32, i32
  }
  func.func @transform_4(%arg0: i32) -> (i32, i32) {
    %c0_i32 = arith.constant 0 : i32
    %c0_i32_0 = arith.constant 0 : i32
    %c0_i32_1 = arith.constant 0 : i32
    return %c0_i32, %c0_i32_0 : i32, i32
  }
  func.func @transform_5(%arg0: i32) -> (i32, i32) {
    %c0_i32 = arith.constant 0 : i32
    %c0_i32_0 = arith.constant 0 : i32
    %c0_i32_1 = arith.constant 0 : i32
    return %c0_i32, %c0_i32_0 : i32, i32
  }
  func.func @transform_6(%arg0: i32) -> (i32, i32) {
    %c0_i32 = arith.constant 0 : i32
    %c0_i32_0 = arith.constant 0 : i32
    %c0_i32_1 = arith.constant 0 : i32
    return %c0_i32, %c0_i32_0 : i32, i32
  }
  func.func @transform_7(%arg0: i32) -> (i32, i32) {
    %c0_i32 = arith.constant 0 : i32
    %c0_i32_0 = arith.constant 0 : i32
    return %arg0, %c0_i32 : i32, i32
  }
}

module attributes {stable_mosaic.version = 11 : i64} {
  func.func @_classifier_kernel(%arg0: i32, %arg1: memref<8x32xbf16, #tpu.memory_space<vmem>>, %arg2: memref<32x64xbf16, #tpu.memory_space<vmem>>, %arg3: memref<1x64xf32, #tpu.memory_space<vmem>>, %arg4: memref<1x64xf32, #tpu.memory_space<vmem>>, %arg5: memref<1x64xf32, #tpu.memory_space<vmem>>, %arg6: memref<64x128xbf16, #tpu.memory_space<vmem>>, %arg7: memref<1x128xf32, #tpu.memory_space<vmem>>, %arg8: memref<8x128xf32, #tpu.memory_space<vmem>>) attributes {dimension_semantics = [#tpu.dimension_semantics<parallel>], iteration_bounds = array<i64: 4>, scalar_prefetch = 0 : i64, scratch_operands = 0 : i64, tpu.core_type = #tpu.core_type<tc>, window_params = [{transform_indices = @transform_0, window_bounds = array<i64: 8, 32>}, {pipeline_mode = #tpu.pipeline_mode<synchronous>, transform_indices = @transform_1, window_bounds = array<i64: 32, 64>}, {pipeline_mode = #tpu.pipeline_mode<synchronous>, transform_indices = @transform_2, window_bounds = array<i64: 1, 64>}, {pipeline_mode = #tpu.pipeline_mode<synchronous>, transform_indices = @transform_3, window_bounds = array<i64: 1, 64>}, {pipeline_mode = #tpu.pipeline_mode<synchronous>, transform_indices = @transform_4, window_bounds = array<i64: 1, 64>}, {pipeline_mode = #tpu.pipeline_mode<synchronous>, transform_indices = @transform_5, window_bounds = array<i64: 64, 128>}, {pipeline_mode = #tpu.pipeline_mode<synchronous>, transform_indices = @transform_6, window_bounds = array<i64: 1, 128>}, {transform_indices = @transform_7, window_bounds = array<i64: 8, 128>}]} {
    %c0 = arith.constant 0 : index
    %c0_0 = arith.constant 0 : index
    %0 = vector.load %arg1[%c0, %c0_0] : memref<8x32xbf16, #tpu.memory_space<vmem>>, vector<8x32xbf16>
    %c0_1 = arith.constant 0 : index
    %c0_2 = arith.constant 0 : index
    %1 = vector.load %arg2[%c0_1, %c0_2] : memref<32x64xbf16, #tpu.memory_space<vmem>>, vector<32x64xbf16>
    %cst = arith.constant dense<0.000000e+00> : vector<8x64xf32>
    %2 = tpu.matmul %0, %1, %cst {dimension_numbers = #tpu.dot_dimension_numbers<[1], [0], [0], [1], [0, 0, 1, 1], [], []>} : vector<8x32xbf16>, vector<32x64xbf16>, vector<8x64xf32> -> vector<8x64xf32>
    %c0_3 = arith.constant 0 : index
    %c0_4 = arith.constant 0 : index
    %3 = vector.load %arg3[%c0_3, %c0_4] : memref<1x64xf32, #tpu.memory_space<vmem>>, vector<1x64xf32>
    %4 = vector.broadcast %3 : vector<1x64xf32> to vector<8x64xf32>
    %5 = arith.addf %2, %4 : vector<8x64xf32>
    %cst_5 = arith.constant 5.000000e-01 : f32
    %6 = vector.broadcast %cst_5 : f32 to vector<8x64xf32>
    %7 = arith.mulf %6, %5 : vector<8x64xf32>
    %cst_6 = arith.constant 0.707106769 : f32
    %8 = vector.broadcast %cst_6 : f32 to vector<8x64xf32>
    %9 = arith.mulf %5, %8 : vector<8x64xf32>
    %10 = math.erf %9 : vector<8x64xf32>
    %cst_7 = arith.constant 1.000000e+00 : f32
    %11 = vector.broadcast %cst_7 : f32 to vector<8x64xf32>
    %12 = arith.addf %11, %10 : vector<8x64xf32>
    %13 = arith.mulf %7, %12 : vector<8x64xf32>
    %cst_8 = arith.constant dense<0.000000e+00> : vector<8xf32>
    %14 = vector.multi_reduction <add>, %13, %cst_8 [1] : vector<8x64xf32> to vector<8xf32>
    %15 = vector.shape_cast %14 : vector<8xf32> to vector<8x1xf32>
    %cst_9 = arith.constant 6.400000e+01 : f32
    %16 = vector.broadcast %cst_9 : f32 to vector<8x1xf32>
    %17 = arith.divf %15, %16 : vector<8x1xf32>
    %18 = vector.broadcast %17 : vector<8x1xf32> to vector<8x64xf32>
    %19 = arith.subf %13, %18 : vector<8x64xf32>
    %20 = vector.broadcast %17 : vector<8x1xf32> to vector<8x64xf32>
    %21 = arith.subf %13, %20 : vector<8x64xf32>
    %22 = arith.mulf %19, %21 : vector<8x64xf32>
    %cst_10 = arith.constant dense<0.000000e+00> : vector<8xf32>
    %23 = vector.multi_reduction <add>, %22, %cst_10 [1] : vector<8x64xf32> to vector<8xf32>
    %24 = vector.shape_cast %23 : vector<8xf32> to vector<8x1xf32>
    %cst_11 = arith.constant 6.400000e+01 : f32
    %25 = vector.broadcast %cst_11 : f32 to vector<8x1xf32>
    %26 = arith.divf %24, %25 : vector<8x1xf32>
    %27 = vector.broadcast %17 : vector<8x1xf32> to vector<8x64xf32>
    %28 = arith.subf %13, %27 : vector<8x64xf32>
    %cst_12 = arith.constant 9.99999996E-13 : f32
    %29 = vector.broadcast %cst_12 : f32 to vector<8x1xf32>
    %30 = arith.addf %26, %29 : vector<8x1xf32>
    %31 = math.rsqrt %30 : vector<8x1xf32>
    %32 = vector.broadcast %31 : vector<8x1xf32> to vector<8x64xf32>
    %33 = arith.mulf %28, %32 : vector<8x64xf32>
    %c0_13 = arith.constant 0 : index
    %c0_14 = arith.constant 0 : index
    %34 = vector.load %arg4[%c0_13, %c0_14] : memref<1x64xf32, #tpu.memory_space<vmem>>, vector<1x64xf32>
    %35 = vector.broadcast %34 : vector<1x64xf32> to vector<8x64xf32>
    %36 = arith.mulf %33, %35 : vector<8x64xf32>
    %c0_15 = arith.constant 0 : index
    %c0_16 = arith.constant 0 : index
    %37 = vector.load %arg5[%c0_15, %c0_16] : memref<1x64xf32, #tpu.memory_space<vmem>>, vector<1x64xf32>
    %38 = vector.broadcast %37 : vector<1x64xf32> to vector<8x64xf32>
    %39 = arith.addf %36, %38 : vector<8x64xf32>
    %40 = arith.truncf %39 : vector<8x64xf32> to vector<8x64xbf16>
    %c0_17 = arith.constant 0 : index
    %c0_18 = arith.constant 0 : index
    %41 = vector.load %arg6[%c0_17, %c0_18] : memref<64x128xbf16, #tpu.memory_space<vmem>>, vector<64x128xbf16>
    %cst_19 = arith.constant dense<0.000000e+00> : vector<8x128xf32>
    %42 = tpu.matmul %40, %41, %cst_19 {dimension_numbers = #tpu.dot_dimension_numbers<[1], [0], [0], [1], [0, 0, 1, 1], [], []>} : vector<8x64xbf16>, vector<64x128xbf16>, vector<8x128xf32> -> vector<8x128xf32>
    %c0_20 = arith.constant 0 : index
    %c0_21 = arith.constant 0 : index
    %43 = vector.load %arg7[%c0_20, %c0_21] : memref<1x128xf32, #tpu.memory_space<vmem>>, vector<1x128xf32>
    %44 = vector.broadcast %43 : vector<1x128xf32> to vector<8x128xf32>
    %45 = arith.addf %42, %44 : vector<8x128xf32>
    %c0_22 = arith.constant 0 : index
    %c0_23 = arith.constant 0 : index
    %46 = vector.load %arg8[%c0_22, %c0_23] : memref<8x128xf32, #tpu.memory_space<vmem>>, vector<8x128xf32>
    tpu.vector_store %arg8[%c0_22, %c0_23], %45 {strides = array<i32>} : memref<8x128xf32, #tpu.memory_space<vmem>>, vector<8x128xf32>,
    return
  }
  func.func @transform_0(%arg0: i32) -> (i32, i32) {
    %c0_i32 = arith.constant 0 : i32
    %c0_i32_0 = arith.constant 0 : i32
    return %arg0, %c0_i32 : i32, i32
  }
  func.func @transform_1(%arg0: i32) -> (i32, i32) {
    %c0_i32 = arith.constant 0 : i32
    %c0_i32_0 = arith.constant 0 : i32
    %c0_i32_1 = arith.constant 0 : i32
    return %c0_i32, %c0_i32_0 : i32, i32
  }
  func.func @transform_2(%arg0: i32) -> (i32, i32) {
    %c0_i32 = arith.constant 0 : i32
    %c0_i32_0 = arith.constant 0 : i32
    %c0_i32_1 = arith.constant 0 : i32
    return %c0_i32, %c0_i32_0 : i32, i32
  }
  func.func @transform_3(%arg0: i32) -> (i32, i32) {
    %c0_i32 = arith.constant 0 : i32
    %c0_i32_0 = arith.constant 0 : i32
    %c0_i32_1 = arith.constant 0 : i32
    return %c0_i32, %c0_i32_0 : i32, i32
  }
  func.func @transform_4(%arg0: i32) -> (i32, i32) {
    %c0_i32 = arith.constant 0 : i32
    %c0_i32_0 = arith.constant 0 : i32
    %c0_i32_1 = arith.constant 0 : i32
    return %c0_i32, %c0_i32_0 : i32, i32
  }
  func.func @transform_5(%arg0: i32) -> (i32, i32) {
    %c0_i32 = arith.constant 0 : i32
    %c0_i32_0 = arith.constant 0 : i32
    %c0_i32_1 = arith.constant 0 : i32
    return %c0_i32, %c0_i32_0 : i32, i32
  }
  func.func @transform_6(%arg0: i32) -> (i32, i32) {
    %c0_i32 = arith.constant 0 : i32
    %c0_i32_0 = arith.constant 0 : i32
    %c0_i32_1 = arith.constant 0 : i32
    return %c0_i32, %c0_i32_0 : i32, i32
  }
  func.func @transform_7(%arg0: i32) -> (i32, i32) {
    %c0_i32 = arith.constant 0 : i32
    %c0_i32_0 = arith.constant 0 : i32
    return %arg0, %c0_i32 : i32, i32
  }
}

</mosaic_0001>

<bundles_post_ra>
// kernel: tpu_custom_call.1
= control target key start
LH: loop header
LB: loop body
LE: loop exit
PB: predicated region body
PF: predicated region fallthrough
CT: control target
= control target key end

     0   :  { %s1141_s0 = inlined_call_operand.hbm [shape: bf16[32,32], index: 0, kind: input, shape index: {}]   ;;  %s1142_s1 = inlined_call_operand.hbm [shape: bf16[32,64], index: 1, kind: input, shape index: {}]   ;;  %s1143_s2 = inlined_call_operand.vmem [shape: f32[1,64], index: 2, kind: input, shape index: {}]   ;;  %s1144_s3 = inlined_call_operand.vmem [shape: f32[1,64], index: 3, kind: input, shape index: {}]   ;;  %s1145_s4 = inlined_call_operand.vmem [shape: f32[1,64], index: 4, kind: input, shape index: {}]   ;;  %s1146_s5 = inlined_call_operand.hbm [shape: bf16[64,128], index: 5, kind: input, shape index: {}]   ;;  %s1147_s6 = inlined_call_operand.vmem [shape: f32[1,128], index: 6, kind: input, shape index: {}]   ;;  %s1148_s7 = inlined_call_operand.hbm [shape: f32[32,128], index: 7, kind: output, shape index: {}]  }
   0x1   :  { %1153 = sst [smem:[#allocation12_spill]] %s1142_s1 }
   0x2   :  { %1154 = sst [smem:[#allocation13_spill]] %s1146_s5 }
   0x3   :  { %12 = vsyncpa [#allocation3], 0 }
   0x4   :  { %14 = vsyncpa [#allocation3 + $0x1], 0 }
   0x5   :  { %15 = vsyncpa [#allocation6], 0 }
   0x6   :  { %16 = vsyncpa [#allocation4], 0 }
   0x7   :  { %18 = vsyncpa [#allocation4 + $0x1], 0  ;;  %s950_s24 = smov 0   ;;  %s952_s25 = smov 0  }
   0x8   :  { %s954_s26 = smov 0   ;;  %s956_s27 = smov 0  }
   0x9 LB: > { %s971_s28 = sadd.s32 4294967295, %s900_s27   ;;  %s615_s29 = sadd.s32 4294967294, %s900_s27   ;;  %s900_s27 = sphi %s956_s27, %s1173_s27   ;;  %s896_s26 = sphi %s954_s26, %s1172_s26   ;;  %s892_s25 = sphi %s952_s25, %s1171_s25   ;;  %s888_s24 = sphi %s950_s24, %s1170_s24  }
   0xa   : > { %p44_p0 = scmp.ne.s32.totalorder %s892_s25, %s888_s24  ;;  %p1149_p1 = scmp.eq.s32.totalorder %s971_s28, 0 }
   0xb   : > { %p200_p3 = scmp.eq.s32.totalorder %s615_s29, 3  ;;  %p616_p5 = scmp.ge.s32.totalorder %s900_s27, 1 }
   0xc   : > { %p980_p4 = por %p1149_p1, %p44_p0  ;;  %p207_p7 = scmp.lt.s32.totalorder %s900_s27, 5 }
   0xd   : > { %p985_p6 = por %p200_p3, %p44_p0  ;;  %s902_s10 = smov [#allocation5]  }
   0xe   : > { %s1155_s30 = scalar_select %p980_p4, 1, 0 }
   0xf   : > { %s1156_s8 = scalar_select %p985_p6, 1, 0 }
  0x10   : > { %p990_p8 = pnand %p616_p5, %p207_p7  ;;  %s219_s11 = sshll.u32 %s902_s10, 4  ;;  %s220_s11 = int_to_ptr.vmem [resolvable:$true] %s219_s11 }
  0x11   : > { %s903_s13 = smov [#allocation7]   ;;  %s763_s15 = scalar_lea.vmem %s220_s11, 256 }
  0x12   : > { %s1157_s9 = scalar_select %p990_p8, 1, 0 }
  0x13   : > { %p683_p9 = pneg %p990_p8  ;;  %s241_s14 = sshll.u32 %s903_s13, 4  ;;  %s242_s14 = int_to_ptr.vmem [resolvable:$true] %s241_s14 }
  0x14   : > { %p764_p12 = scmp.ne.s32.totalorder %s220_s11, %s763_s15  ;;  %p771_p3 = scmp.lt.s32.totalorder %s220_s11, %s220_s11 }
  0x15   : > { %p998_p10 = pnand %p683_p9, %p1149_p1  ;;  %p772_p5 = scmp.lt.s32.totalorder %s763_s15, %s763_s15 }
  0x17   : > { %p754_p11 = pneg %p998_p10  ;;  %p773_p7 = por %p772_p5, %p771_p3 }
  0x19   : > { %p766_p13 = pnand %p764_p12, %p754_p11 }
  0x1b   : > { %p767_p0 = pneg %p766_p13 }
  0x1d   : > { %p774_p9 = pnand %p773_p7, %p767_p0 }
  0x1f   : > { %777 = shalt.err (!%p774_p9)
}
  0x20   : > { %s904_s16 = smov 64   ;;  %s905_s17 = smov 4  }
  0x21   : > { %s1159_s1 = sld [smem:[#allocation12_spill]]  ;;  %s789_s20 = scalar_lea.vmem %s242_s14, 512 }
  0x22   : > { %p790_p1 = scmp.ne.s32.totalorder %s242_s14, %s789_s20  ;;  %p797_p2 = scmp.lt.s32.totalorder %s242_s14, %s242_s14 }
  0x23   : > { %p798_p6 = scmp.lt.s32.totalorder %s789_s20, %s789_s20 }
  0x24   : > { %p792_p12 = pnand %p790_p1, %p754_p11 }
  0x25   : > { %p799_p3 = por %p798_p6, %p797_p2 }
  0x26   : > { %p793_p13 = pneg %p792_p12 }
  0x27   : > { %686 = dma.hbm_to_vmem [thread:$0]  (!%p998_p10), %s1159_s1, 256, %s220_s11, [#allocation6], %s904_s16, %s904_s16, %s905_s17  }
  0x28   : > { %p800_p0 = pnand %p799_p3, %p793_p13 }
  0x2a   : > { %803 = shalt.err (!%p800_p0)
}
  0x2b   : > { %s1160_s5 = sld [smem:[#allocation13_spill]]  ;;  %s1021_s23 = sadd.s32 1, %s900_s27  }
  0x2c   : > { %s31_s29 = sadd.s32 1, %s896_s26  ;;  %s28_s10 = ssub.s32 %s900_s27, %s1021_s23 }
  0x2d   : > { %p38_p1 = scmp.ne.s32.totalorder %s896_s26, %s892_s25  ;;  %p29_p2 = scmp.eq.s32.totalorder %s28_s10, 0 }
  0x2e   : > { %p39_p6 = scmp.eq.s32.totalorder %s900_s27, 0  ;;  %p1161_p11 = scmp.eq.s32.totalorder %s971_s28, 3 }
  0x2f   : > { %p700_p7 = scmp.lt.s32.totalorder %s900_s27, 4  ;;  %s258_s13 = sand.u32 1, %s896_s26  }
  0x30   : > { %p1031_p5 = por %p1161_p11, %p38_p1  ;;  %p40_p9 = por %p39_p6, %p38_p1 }
  0x31   : > { %689 = dma.hbm_to_vmem [thread:$0]  (!%p998_p10), %s1160_s5, 512, %s242_s14, [#allocation6], %s904_s16, %s904_s16, %s905_s17  }
  0x32   : > { %s1162_s11 = scalar_select %p1031_p5, 1, 0 }
  0x33   : > { %s1037_s12 = scalar_select %p29_p2, %s896_s26, %s31_s29  }
  0x34   : > { %s620_s15 = sshll.u32 %s258_s13, 2  ;;  %s621_s14 = sshll.u32 %s900_s27, 6 }
  0x35   : > { %s1044_s18 = scalar_lea.hbm %s1141_s0, %s621_s14  ;;  %s262_s19 = scalar_lea.vmem [#allocation2], %s620_s15 }
  0x36   : > { %s269_s20 = sshll.u32 %s262_s19, 4  ;;  %p1046_p10 = pnand %p700_p7, %p40_p9  ;;  %s270_s20 = int_to_ptr.vmem [resolvable:$true] %s269_s20 }
  0x37   : > { %s259_s22 = scalar_lea.sflag [#allocation3], %s258_s13  ;;  %s804_s29 = scalar_lea.hbm %s1044_s18, 64 }
  0x38   : > { %p805_p12 = scmp.ne.s32.totalorder %s1044_s18, %s804_s29  ;;  %p806_p13 = pneg %p1046_p10 }
  0x39   : > { %s809_s16 = scalar_lea.hbm %s1141_s0, 256  ;;  %p810_p1 = scmp.lt.s32.totalorder %s1044_s18, %s1141_s0 }
  0x3a   : > { %p807_p3 = pnand %p806_p13, %p805_p12  ;;  %p811_p2 = scmp.lt.s32.totalorder %s809_s16, %s804_s29 }
  0x3c   : > { %p808_p0 = pneg %p807_p3  ;;  %p812_p6 = por %p811_p2, %p810_p1 }
  0x3e   : > { %p813_p11 = pnand %p812_p6, %p808_p0 }
  0x40   : > { %816 = shalt.err (!%p813_p11)
}
  0x41   : > { %s817_s19 = scalar_lea.vmem %s270_s20, 64  ;;  %s906_s13 = smov [#allocation2]  }
  0x42   : > { %p818_p7 = scmp.ne.s32.totalorder %s270_s20, %s817_s19  ;;  %s822_s1 = sshll.u32 %s906_s13, 4  ;;  %s823_s1 = int_to_ptr.vmem [resolvable:$false] %s822_s1 }
  0x43   : > { %s824_s5 = scalar_lea.vmem %s823_s1, 128  ;;  %p825_p12 = scmp.lt.s32.totalorder %s270_s20, %s823_s1 }
  0x44   : > { %p820_p9 = pnand %p818_p7, %p806_p13  ;;  %p826_p3 = scmp.lt.s32.totalorder %s824_s5, %s817_s19 }
  0x46   : > { %p821_p5 = pneg %p820_p9  ;;  %p827_p4 = por %p826_p3, %p825_p12 }
  0x48   : > { %p828_p8 = pnand %p827_p4, %p821_p5 }
  0x4a   : > { %831 = shalt.err (!%p828_p8)
}
  0x4b   : > { %693 = dma.hbm_to_vmem [thread:$0]  (!%p1046_p10), %s1044_s18, 64, %s270_s20, %s259_s22  }
  0x4c   : > { %p1164_p0 = scmp.ne.s32.totalorder %s1157_s9, 0 }
  0x4d   : > { %s1067_s29 = sand.u32 (!%p1164_p0), 1, %s892_s25   ;;  %p1165_p13 = scmp.ne.s32.totalorder (!%p1164_p0), %s1155_s30, 0 }
  0x4e   : > { %278 = sbr.rel (%p1164_p0) target bundleno = 831 (0x33f), region = 48  ;;  %s623_s10 = sshll.u32 (!%p1164_p0), %s1067_s29, 2 }
  0x4f   : > { %s281_s14 = scalar_lea.sflag (!%p1164_p0), [#allocation3], %s1067_s29  ;;  %s284_s1 = scalar_lea.vmem (!%p1164_p0), [#allocation2], %s623_s10 }
  0x53   : > { %875 = dma.done.wait (%p1165_p13), %s281_s14, 64  }
  0x54   : > { %877 = vsyncadd (%p1165_p13), %s281_s14, 4294967232  ;;  %p1166_p4 = scmp.eq.s32.totalorder %s971_s28, 0 }
  0x56   : > { %879 = dma.done.wait (%p1166_p4), [#allocation6], 768   ;;  %p1167_p8 = pmov %p1166_p4 }
  0x57   : > { %v907_v0 = vmov 0.0   ;;  %vm908_vm0 = vmmov 0   ;;  %v742_v1 = vld [vmem:[#allocation5 + $0x8] sm:$0xff]   ;;  %v743_v2 = vld [vmem:[#allocation5] sm:$0xff]   ;;  %v324_v3 = vld [vmem:[%s284_s1] sm:$0xf] }
  0x58   : > { %881 = vsyncadd (%p1167_p8), [#allocation6], 4294966528  ;;  %651 = vmatprep.subr.bf16.mxu0 %v907_v0  ;;  %655 = vmatprep.mubr.msk.bf16.mxu0 %vm908_vm0, %v907_v0  ;;  %vm348_vm1 = vcmask 261120   ;;  %v627_v4 = vld [vmem:[%s1143_s2] ss:$0 sm:$0xff]  ;;  %vm397_vm2 = vcmask 523264  }
  0x59   : > { %659 = vmatprep.subr.bf16.mxu1 %v907_v0  ;;  %667 = vmatprep.mubr.msk.bf16.mxu1 %vm908_vm0, %v907_v0  ;;  %v744_v21 = vld [vmem:[#allocation7 + $0x18] sm:$0xff]   ;;  %v745_v22 = vld [vmem:[#allocation7 + $0x10] sm:$0xff]   ;;  %v746_v23 = vld [vmem:[#allocation7 + $0x8] sm:$0xff]   ;;  %s626_s22 = sshll.u32 %s1067_s29, 3  ;;  %s640_s15 = sshll.u32 %s971_s28, 7 }
  0x5a   : > { %652 = vmatpush3.bf16.msra.mxu0 %v742_v1  ;;  %660 = vmatpush3.bf16.msra.mxu1 %v744_v21  ;;  %v747_v24 = vld [vmem:[#allocation7] sm:$0xff]   ;;  %v631_v29 = vld [vmem:[%s1144_s3] ss:$0 sm:$0xff]  ;;  %s322_s19 = scalar_lea.vmem [#allocation8], %s626_s22  ;;  %s1099_s1 = scalar_lea.hbm %s1148_s7, %s640_s15 }
  0x5b   : > { %653 = vmatprep.subr.bf16.mxu0 %v907_v0  ;;  %661 = vmatprep.subr.bf16.mxu1 %v907_v0  ;;  %v632_v31 = vld [vmem:[%s1145_s4] ss:$0 sm:$0xff]  ;;  %s526_s13 = sshll.u32 %s322_s19, 4  ;;  %s513_s5 = scalar_lea.sflag [#allocation4], %s1067_s29  ;;  %s1101_s13 = int_to_ptr.vmem [resolvable:$true] %s526_s13 }
  0x5c   : > { %v633_v35 = vld [vmem:[%s1147_s6] ss:$0 sm:$0xff]  ;;  %s832_s30 = scalar_lea.vmem %s1101_s13, 128  ;;  %p1168_p10 = scmp.ne.s32.totalorder %s1162_s11, 0 }
  0x5d   : > { %p833_p5 = scmp.ne.s32.totalorder %s1101_s13, %s832_s30  ;;  %s909_s28 = smov [#allocation8]  }
  0x5e   : > { %654 = vmatpush3.bf16.msra.mxu0 %v743_v2  ;;  %662 = vmatpush3.bf16.msra.mxu1 %v745_v22  ;;  %s836_s9 = sshll.u32 %s909_s28, 4  ;;  %s837_s9 = int_to_ptr.vmem [resolvable:$false] %s836_s9 }
  0x5f   : > { %663 = vmatprep.subr.bf16.mxu1 %v907_v0  ;;  %p834_p1 = pnand %p833_p5, %p1168_p10  ;;  %s838_s18 = scalar_lea.vmem %s837_s9, 256 }
  0x60   : > { %p839_p6 = scmp.lt.s32.totalorder %s1101_s13, %s837_s9  ;;  %p840_p11 = scmp.lt.s32.totalorder %s838_s18, %s832_s30 }
  0x61   : > { %656 = vmatmul.mubr.msk.bf16.vlgmr.msra.gmra.mxu0 %vm348_vm1, %v324_v3  ;;  %p835_p2 = pneg %p834_p1 }
  0x62   : > { %664 = vmatpush3.bf16.msra.mxu1 %v746_v23  ;;  %p841_p7 = por %p840_p11, %p839_p6 }
  0x63   : > { %665 = vmatprep.subr.bf16.mxu1 %v907_v0 }
  0x64   : > { %p842_p9 = pnand %p841_p7, %p835_p2 }
  0x66   : > { %666 = vmatpush3.bf16.msra.mxu1 %v747_v24 }
 0x121   : > { %v386_v5 = vpop.f32.mrf.mxu0 }
 0x122   : > { %v387_v6 = vadd.f32 %v627_v4, %v386_v5 }
 0x123   : > { %v657_v7 = vpop.f32.mrf.mxu0 }
 0x124   : > { %v393_v8 = vmul.f32 0.70710677, %v387_v6  ;;  %v392_v12 = vmul.f32 0.5, %v387_v6 }
 0x125   : > { %v389_v9 = vpop.f32.mrf.mxu0 }
 0x126   : > { %748 = verf.f32 %v393_v8 }
 0x127   : > { %v658_v10 = vpop.f32.mrf.mxu0 }
 0x133   : > { %v749_v11 = vpop.eup %748 }
 0x134   : > { %v395_v13 = vadd.f32 1.0, %v749_v11 }
 0x136   : > { %v396_v14 = vmul.f32 %v395_v13, %v392_v12 }
 0x138   : > { %v398_v15 = vsel %vm397_vm2, %v396_v14, 0.0 }
 0x139   : > { %399 = vadd.xlane.f32.xlu0 %v398_v15 }
 0x1c2   : > { %v400_v16 = vpop.xlane.xlu0 %399 }
 0x1c3   : > { %v402_v17 = vmul.f32 0.015625, %v400_v16 }
 0x1c5   : > { %v403_v18 = vsub.f32 %v396_v14, %v402_v17 }
 0x1c7   : > { %v404_v19 = vmul.f32 %v403_v18, %v403_v18 }
 0x1c9   : > { %v405_v20 = vsel %vm397_vm2, %v404_v19, 0.0 }
 0x1ca   : > { %406 = vadd.xlane.f32.xlu0 %v405_v20 }
 0x253   : > { %v407_v25 = vpop.xlane.xlu0 %406 }
 0x254   : > { %v408_v26 = vmul.f32 0.015625, %v407_v25 }
 0x256   : > { %v409_v27 = vadd.f32 1e-12, %v408_v26 }
 0x258   : > { %750 = vrsqrt.f32 %v409_v27 }
 0x265   : > { %v751_v28 = vpop.eup %750 }
 0x266   : > { %v411_v30 = vmul.f32 %v751_v28, %v403_v18 }
 0x268   : > { %v419_v32 = vmul.f32 %v631_v29, %v411_v30 }
 0x26a   : > { %v427_v33 = vadd.f32 %v632_v31, %v419_v32 }
 0x26c   : > { %v428_v34 = vpack.c.bf16 %v427_v33, %v427_v33 }
 0x26e   : > { %668 = vmatmul.mubr.msk.bf16.vlgmr.msra.gmra.mxu1 %vm397_vm2, %v428_v34 }
 0x32e   : > { %v505_v36 = vpop.f32.mrf.mxu1 }
 0x32f   : > { %v506_v37 = vadd.f32 %v633_v35, %v505_v36 }
 0x330   : > { %v669_v38 = vpop.f32.mrf.mxu1 }
 0x331   : > { %511 = vst [vmem:[%s322_s19] sm:$0xff] %v506_v37 }
 0x332   : > { %v508_v39 = vpop.f32.mrf.mxu1 }
 0x333   : > { %845 = shalt.err (!%p842_p9)
}
 0x334   : > { %s846_s20 = scalar_lea.hbm %s1099_s1, 128  ;;  %s850_s22 = scalar_lea.hbm %s1148_s7, 512 }
 0x335   : > { %p847_p12 = scmp.ne.s32.totalorder %s1099_s1, %s846_s20  ;;  %p851_p13 = scmp.lt.s32.totalorder %s1099_s1, %s1148_s7 }
 0x336   : > { %p852_p4 = scmp.lt.s32.totalorder %s850_s22, %s846_s20 }
 0x337   : > { %p848_p3 = pnand %p847_p12, %p1168_p10 }
 0x338   : > { %p853_p8 = por %p852_p4, %p851_p13 }
 0x339   : > { %p849_p0 = pneg %p848_p3 }
 0x33b   : > { %p854_p5 = pnand %p853_p8, %p849_p0 }
 0x33d   : > { %857 = shalt.err (!%p854_p5)
}
 0x33e   : > { %681 = dma.vmem_to_hbm [thread:$0]  (%p1168_p10), %s1101_s13, 128, %s1099_s1, %s513_s5   ;;  %v670_v40 = vpop.f32.mrf.mxu1 }
 0x33f PF: > { %p703_p1 = scmp.ge.s32.totalorder %s900_s27, 2  ;;  %s538_s15 = sand.u32 1, %s888_s24  }
 0x340   : > { %p1169_p2 = scmp.ne.s32.totalorder %s1156_s8, 0  ;;  %s539_s19 = scalar_lea.sflag [#allocation4], %s538_s15 }
 0x342   : > { %p695_p6 = pnand %p703_p1, %p1169_p2 }
 0x344   : > { %p696_p11 = pneg %p695_p6 }
 0x346   : > { %883 = dma.done.wait (%p696_p11), %s539_s19, 128  }
 0x347   : > { %885 = vsyncadd (%p696_p11), %s539_s19, 4294967168  ;;  %p21_p7 = scmp.ge.s32.totalorder %s1021_s23, 6   ;;  %s1170_s24 = smov %s892_s25 }
 0x348   : > { %s1171_s25 = smov %s896_s26  ;;  %s1172_s26 = smov %s1037_s12 }
 0x349   : > { %s1173_s27 = smov %s1021_s23  ;;  %23 = sbr.rel (!%p21_p7) target bundleno = 9 (0x9), region = 101 }
 0x34e   :  { %544 = vsyncpa [#allocation3], 1 }
 0x34f   :  { %546 = vsyncpa [#allocation3 + $0x1], 1 }
 0x350   :  { %547 = vsyncpa [#allocation6], 1 }
 0x351   :  { %548 = vsyncpa [#allocation4], 1 }
 0x352   :  { %550 = vsyncpa [#allocation4 + $0x1], 1 }

// kernel: tpu_custom_call.1
= control target key start
LH: loop header
LB: loop body
LE: loop exit
PB: predicated region body
PF: predicated region fallthrough
CT: control target
= control target key end

     0   :  { %s1141_s0 = inlined_call_operand.hbm [shape: bf16[32,32], index: 0, kind: input, shape index: {}]   ;;  %s1142_s1 = inlined_call_operand.hbm [shape: bf16[32,64], index: 1, kind: input, shape index: {}]   ;;  %s1143_s2 = inlined_call_operand.vmem [shape: f32[1,64], index: 2, kind: input, shape index: {}]   ;;  %s1144_s3 = inlined_call_operand.vmem [shape: f32[1,64], index: 3, kind: input, shape index: {}]   ;;  %s1145_s4 = inlined_call_operand.vmem [shape: f32[1,64], index: 4, kind: input, shape index: {}]   ;;  %s1146_s5 = inlined_call_operand.hbm [shape: bf16[64,128], index: 5, kind: input, shape index: {}]   ;;  %s1147_s6 = inlined_call_operand.vmem [shape: f32[1,128], index: 6, kind: input, shape index: {}]   ;;  %s1148_s7 = inlined_call_operand.hbm [shape: f32[32,128], index: 7, kind: output, shape index: {}]  }
   0x1   :  { %1153 = sst [smem:[#allocation12_spill]] %s1142_s1 }
   0x2   :  { %1154 = sst [smem:[#allocation13_spill]] %s1146_s5 }
   0x3   :  { %12 = vsyncpa [#allocation3], 0 }
   0x4   :  { %14 = vsyncpa [#allocation3 + $0x1], 0 }
   0x5   :  { %15 = vsyncpa [#allocation6], 0 }
   0x6   :  { %16 = vsyncpa [#allocation4], 0 }
   0x7   :  { %18 = vsyncpa [#allocation4 + $0x1], 0  ;;  %s950_s24 = smov 0   ;;  %s952_s25 = smov 0  }
   0x8   :  { %s954_s26 = smov 0   ;;  %s956_s27 = smov 0  }
   0x9 LB: > { %s971_s28 = sadd.s32 4294967295, %s900_s27   ;;  %s615_s29 = sadd.s32 4294967294, %s900_s27   ;;  %s900_s27 = sphi %s956_s27, %s1173_s27   ;;  %s896_s26 = sphi %s954_s26, %s1172_s26   ;;  %s892_s25 = sphi %s952_s25, %s1171_s25   ;;  %s888_s24 = sphi %s950_s24, %s1170_s24  }
   0xa   : > { %p44_p0 = scmp.ne.s32.totalorder %s892_s25, %s888_s24  ;;  %p1149_p1 = scmp.eq.s32.totalorder %s971_s28, 0 }
   0xb   : > { %p200_p3 = scmp.eq.s32.totalorder %s615_s29, 3  ;;  %p616_p5 = scmp.ge.s32.totalorder %s900_s27, 1 }
   0xc   : > { %p980_p4 = por %p1149_p1, %p44_p0  ;;  %p207_p7 = scmp.lt.s32.totalorder %s900_s27, 5 }
   0xd   : > { %p985_p6 = por %p200_p3, %p44_p0  ;;  %s902_s10 = smov [#allocation5]  }
   0xe   : > { %s1155_s30 = scalar_select %p980_p4, 1, 0 }
   0xf   : > { %s1156_s8 = scalar_select %p985_p6, 1, 0 }
  0x10   : > { %p990_p8 = pnand %p616_p5, %p207_p7  ;;  %s219_s11 = sshll.u32 %s902_s10, 4  ;;  %s220_s11 = int_to_ptr.vmem [resolvable:$true] %s219_s11 }
  0x11   : > { %s903_s13 = smov [#allocation7]   ;;  %s763_s15 = scalar_lea.vmem %s220_s11, 256 }
  0x12   : > { %s1157_s9 = scalar_select %p990_p8, 1, 0 }
  0x13   : > { %p683_p9 = pneg %p990_p8  ;;  %s241_s14 = sshll.u32 %s903_s13, 4  ;;  %s242_s14 = int_to_ptr.vmem [resolvable:$true] %s241_s14 }
  0x14   : > { %p764_p12 = scmp.ne.s32.totalorder %s220_s11, %s763_s15  ;;  %p771_p3 = scmp.lt.s32.totalorder %s220_s11, %s220_s11 }
  0x15   : > { %p998_p10 = pnand %p683_p9, %p1149_p1  ;;  %p772_p5 = scmp.lt.s32.totalorder %s763_s15, %s763_s15 }
  0x17   : > { %p754_p11 = pneg %p998_p10  ;;  %p773_p7 = por %p772_p5, %p771_p3 }
  0x19   : > { %p766_p13 = pnand %p764_p12, %p754_p11 }
  0x1b   : > { %p767_p0 = pneg %p766_p13 }
  0x1d   : > { %p774_p9 = pnand %p773_p7, %p767_p0 }
  0x1f   : > { %777 = shalt.err (!%p774_p9)
}
  0x20   : > { %s904_s16 = smov 64   ;;  %s905_s17 = smov 4  }
  0x21   : > { %s1159_s1 = sld [smem:[#allocation12_spill]]  ;;  %s789_s20 = scalar_lea.vmem %s242_s14, 512 }
  0x22   : > { %p790_p1 = scmp.ne.s32.totalorder %s242_s14, %s789_s20  ;;  %p797_p2 = scmp.lt.s32.totalorder %s242_s14, %s242_s14 }
  0x23   : > { %p798_p6 = scmp.lt.s32.totalorder %s789_s20, %s789_s20 }
  0x24   : > { %p792_p12 = pnand %p790_p1, %p754_p11 }
  0x25   : > { %p799_p3 = por %p798_p6, %p797_p2 }
  0x26   : > { %p793_p13 = pneg %p792_p12 }
  0x27   : > { %686 = dma.hbm_to_vmem [thread:$0]  (!%p998_p10), %s1159_s1, 256, %s220_s11, [#allocation6], %s904_s16, %s904_s16, %s905_s17  }
  0x28   : > { %p800_p0 = pnand %p799_p3, %p793_p13 }
  0x2a   : > { %803 = shalt.err (!%p800_p0)
}
  0x2b   : > { %s1160_s5 = sld [smem:[#allocation13_spill]]  ;;  %s1021_s23 = sadd.s32 1, %s900_s27  }
  0x2c   : > { %s31_s29 = sadd.s32 1, %s896_s26  ;;  %s28_s10 = ssub.s32 %s900_s27, %s1021_s23 }
  0x2d   : > { %p38_p1 = scmp.ne.s32.totalorder %s896_s26, %s892_s25  ;;  %p29_p2 = scmp.eq.s32.totalorder %s28_s10, 0 }
  0x2e   : > { %p39_p6 = scmp.eq.s32.totalorder %s900_s27, 0  ;;  %p1161_p11 = scmp.eq.s32.totalorder %s971_s28, 3 }
  0x2f   : > { %p700_p7 = scmp.lt.s32.totalorder %s900_s27, 4  ;;  %s258_s13 = sand.u32 1, %s896_s26  }
  0x30   : > { %p1031_p5 = por %p1161_p11, %p38_p1  ;;  %p40_p9 = por %p39_p6, %p38_p1 }
  0x31   : > { %689 = dma.hbm_to_vmem [thread:$0]  (!%p998_p10), %s1160_s5, 512, %s242_s14, [#allocation6], %s904_s16, %s904_s16, %s905_s17  }
  0x32   : > { %s1162_s11 = scalar_select %p1031_p5, 1, 0 }
  0x33   : > { %s1037_s12 = scalar_select %p29_p2, %s896_s26, %s31_s29  }
  0x34   : > { %s620_s15 = sshll.u32 %s258_s13, 2  ;;  %s621_s14 = sshll.u32 %s900_s27, 6 }
  0x35   : > { %s1044_s18 = scalar_lea.hbm %s1141_s0, %s621_s14  ;;  %s262_s19 = scalar_lea.vmem [#allocation2], %s620_s15 }
  0x36   : > { %s269_s20 = sshll.u32 %s262_s19, 4  ;;  %p1046_p10 = pnand %p700_p7, %p40_p9  ;;  %s270_s20 = int_to_ptr.vmem [resolvable:$true] %s269_s20 }
  0x37   : > { %s259_s22 = scalar_lea.sflag [#allocation3], %s258_s13  ;;  %s804_s29 = scalar_lea.hbm %s1044_s18, 64 }
  0x38   : > { %p805_p12 = scmp.ne.s32.totalorder %s1044_s18, %s804_s29  ;;  %p806_p13 = pneg %p1046_p10 }
  0x39   : > { %s809_s16 = scalar_lea.hbm %s1141_s0, 256  ;;  %p810_p1 = scmp.lt.s32.totalorder %s1044_s18, %s1141_s0 }
  0x3a   : > { %p807_p3 = pnand %p806_p13, %p805_p12  ;;  %p811_p2 = scmp.lt.s32.totalorder %s809_s16, %s804_s29 }
  0x3c   : > { %p808_p0 = pneg %p807_p3  ;;  %p812_p6 = por %p811_p2, %p810_p1 }
  0x3e   : > { %p813_p11 = pnand %p812_p6, %p808_p0 }
  0x40   : > { %816 = shalt.err (!%p813_p11)
}
  0x41   : > { %s817_s19 = scalar_lea.vmem %s270_s20, 64  ;;  %s906_s13 = smov [#allocation2]  }
  0x42   : > { %p818_p7 = scmp.ne.s32.totalorder %s270_s20, %s817_s19  ;;  %s822_s1 = sshll.u32 %s906_s13, 4  ;;  %s823_s1 = int_to_ptr.vmem [resolvable:$false] %s822_s1 }
  0x43   : > { %s824_s5 = scalar_lea.vmem %s823_s1, 128  ;;  %p825_p12 = scmp.lt.s32.totalorder %s270_s20, %s823_s1 }
  0x44   : > { %p820_p9 = pnand %p818_p7, %p806_p13  ;;  %p826_p3 = scmp.lt.s32.totalorder %s824_s5, %s817_s19 }
  0x46   : > { %p821_p5 = pneg %p820_p9  ;;  %p827_p4 = por %p826_p3, %p825_p12 }
  0x48   : > { %p828_p8 = pnand %p827_p4, %p821_p5 }
  0x4a   : > { %831 = shalt.err (!%p828_p8)
}
  0x4b   : > { %693 = dma.hbm_to_vmem [thread:$0]  (!%p1046_p10), %s1044_s18, 64, %s270_s20, %s259_s22  }
  0x4c   : > { %p1164_p0 = scmp.ne.s32.totalorder %s1157_s9, 0 }
  0x4d   : > { %s1067_s29 = sand.u32 (!%p1164_p0), 1, %s892_s25   ;;  %p1165_p13 = scmp.ne.s32.totalorder (!%p1164_p0), %s1155_s30, 0 }
  0x4e   : > { %278 = sbr.rel (%p1164_p0) target bundleno = 831 (0x33f), region = 48  ;;  %s623_s10 = sshll.u32 (!%p1164_p0), %s1067_s29, 2 }
  0x4f   : > { %s281_s14 = scalar_lea.sflag (!%p1164_p0), [#allocation3], %s1067_s29  ;;  %s284_s1 = scalar_lea.vmem (!%p1164_p0), [#allocation2], %s623_s10 }
  0x53   : > { %875 = dma.done.wait (%p1165_p13), %s281_s14, 64  }
  0x54   : > { %877 = vsyncadd (%p1165_p13), %s281_s14, 4294967232  ;;  %p1166_p4 = scmp.eq.s32.totalorder %s971_s28, 0 }
  0x56   : > { %879 = dma.done.wait (%p1166_p4), [#allocation6], 768   ;;  %p1167_p8 = pmov %p1166_p4 }
  0x57   : > { %v907_v0 = vmov 0.0   ;;  %vm908_vm0 = vmmov 0   ;;  %v742_v1 = vld [vmem:[#allocation5 + $0x8] sm:$0xff]   ;;  %v743_v2 = vld [vmem:[#allocation5] sm:$0xff]   ;;  %v324_v3 = vld [vmem:[%s284_s1] sm:$0xf] }
  0x58   : > { %881 = vsyncadd (%p1167_p8), [#allocation6], 4294966528  ;;  %651 = vmatprep.subr.bf16.mxu0 %v907_v0  ;;  %655 = vmatprep.mubr.msk.bf16.mxu0 %vm908_vm0, %v907_v0  ;;  %vm348_vm1 = vcmask 261120   ;;  %v627_v4 = vld [vmem:[%s1143_s2] ss:$0 sm:$0xff]  ;;  %vm397_vm2 = vcmask 523264  }
  0x59   : > { %659 = vmatprep.subr.bf16.mxu1 %v907_v0  ;;  %667 = vmatprep.mubr.msk.bf16.mxu1 %vm908_vm0, %v907_v0  ;;  %v744_v21 = vld [vmem:[#allocation7 + $0x18] sm:$0xff]   ;;  %v745_v22 = vld [vmem:[#allocation7 + $0x10] sm:$0xff]   ;;  %v746_v23 = vld [vmem:[#allocation7 + $0x8] sm:$0xff]   ;;  %s626_s22 = sshll.u32 %s1067_s29, 3  ;;  %s640_s15 = sshll.u32 %s971_s28, 7 }
  0x5a   : > { %652 = vmatpush3.bf16.msra.mxu0 %v742_v1  ;;  %660 = vmatpush3.bf16.msra.mxu1 %v744_v21  ;;  %v747_v24 = vld [vmem:[#allocation7] sm:$0xff]   ;;  %v631_v29 = vld [vmem:[%s1144_s3] ss:$0 sm:$0xff]  ;;  %s322_s19 = scalar_lea.vmem [#allocation8], %s626_s22  ;;  %s1099_s1 = scalar_lea.hbm %s1148_s7, %s640_s15 }
  0x5b   : > { %653 = vmatprep.subr.bf16.mxu0 %v907_v0  ;;  %661 = vmatprep.subr.bf16.mxu1 %v907_v0  ;;  %v632_v31 = vld [vmem:[%s1145_s4] ss:$0 sm:$0xff]  ;;  %s526_s13 = sshll.u32 %s322_s19, 4  ;;  %s513_s5 = scalar_lea.sflag [#allocation4], %s1067_s29  ;;  %s1101_s13 = int_to_ptr.vmem [resolvable:$true] %s526_s13 }
  0x5c   : > { %v633_v35 = vld [vmem:[%s1147_s6] ss:$0 sm:$0xff]  ;;  %s832_s30 = scalar_lea.vmem %s1101_s13, 128  ;;  %p1168_p10 = scmp.ne.s32.totalorder %s1162_s11, 0 }
  0x5d   : > { %p833_p5 = scmp.ne.s32.totalorder %s1101_s13, %s832_s30  ;;  %s909_s28 = smov [#allocation8]  }
  0x5e   : > { %654 = vmatpush3.bf16.msra.mxu0 %v743_v2  ;;  %662 = vmatpush3.bf16.msra.mxu1 %v745_v22  ;;  %s836_s9 = sshll.u32 %s909_s28, 4  ;;  %s837_s9 = int_to_ptr.vmem [resolvable:$false] %s836_s9 }
  0x5f   : > { %663 = vmatprep.subr.bf16.mxu1 %v907_v0  ;;  %p834_p1 = pnand %p833_p5, %p1168_p10  ;;  %s838_s18 = scalar_lea.vmem %s837_s9, 256 }
  0x60   : > { %p839_p6 = scmp.lt.s32.totalorder %s1101_s13, %s837_s9  ;;  %p840_p11 = scmp.lt.s32.totalorder %s838_s18, %s832_s30 }
  0x61   : > { %656 = vmatmul.mubr.msk.bf16.vlgmr.msra.gmra.mxu0 %vm348_vm1, %v324_v3  ;;  %p835_p2 = pneg %p834_p1 }
  0x62   : > { %664 = vmatpush3.bf16.msra.mxu1 %v746_v23  ;;  %p841_p7 = por %p840_p11, %p839_p6 }
  0x63   : > { %665 = vmatprep.subr.bf16.mxu1 %v907_v0 }
  0x64   : > { %p842_p9 = pnand %p841_p7, %p835_p2 }
  0x66   : > { %666 = vmatpush3.bf16.msra.mxu1 %v747_v24 }
 0x121   : > { %v386_v5 = vpop.f32.mrf.mxu0 }
 0x122   : > { %v387_v6 = vadd.f32 %v627_v4, %v386_v5 }
 0x123   : > { %v657_v7 = vpop.f32.mrf.mxu0 }
 0x124   : > { %v393_v8 = vmul.f32 0.70710677, %v387_v6  ;;  %v392_v12 = vmul.f32 0.5, %v387_v6 }
 0x125   : > { %v389_v9 = vpop.f32.mrf.mxu0 }
 0x126   : > { %748 = verf.f32 %v393_v8 }
 0x127   : > { %v658_v10 = vpop.f32.mrf.mxu0 }
 0x133   : > { %v749_v11 = vpop.eup %748 }
 0x134   : > { %v395_v13 = vadd.f32 1.0, %v749_v11 }
 0x136   : > { %v396_v14 = vmul.f32 %v395_v13, %v392_v12 }
 0x138   : > { %v398_v15 = vsel %vm397_vm2, %v396_v14, 0.0 }
 0x139   : > { %399 = vadd.xlane.f32.xlu0 %v398_v15 }
 0x1c2   : > { %v400_v16 = vpop.xlane.xlu0 %399 }
 0x1c3   : > { %v402_v17 = vmul.f32 0.015625, %v400_v16 }
 0x1c5   : > { %v403_v18 = vsub.f32 %v396_v14, %v402_v17 }
 0x1c7   : > { %v404_v19 = vmul.f32 %v403_v18, %v403_v18 }
 0x1c9   : > { %v405_v20 = vsel %vm397_vm2, %v404_v19, 0.0 }
 0x1ca   : > { %406 = vadd.xlane.f32.xlu0 %v405_v20 }
 0x253   : > { %v407_v25 = vpop.xlane.xlu0 %406 }
 0x254   : > { %v408_v26 = vmul.f32 0.015625, %v407_v25 }
 0x256   : > { %v409_v27 = vadd.f32 1e-12, %v408_v26 }
 0x258   : > { %750 = vrsqrt.f32 %v409_v27 }
 0x265   : > { %v751_v28 = vpop.eup %750 }
 0x266   : > { %v411_v30 = vmul.f32 %v751_v28, %v403_v18 }
 0x268   : > { %v419_v32 = vmul.f32 %v631_v29, %v411_v30 }
 0x26a   : > { %v427_v33 = vadd.f32 %v632_v31, %v419_v32 }
 0x26c   : > { %v428_v34 = vpack.c.bf16 %v427_v33, %v427_v33 }
 0x26e   : > { %668 = vmatmul.mubr.msk.bf16.vlgmr.msra.gmra.mxu1 %vm397_vm2, %v428_v34 }
 0x32e   : > { %v505_v36 = vpop.f32.mrf.mxu1 }
 0x32f   : > { %v506_v37 = vadd.f32 %v633_v35, %v505_v36 }
 0x330   : > { %v669_v38 = vpop.f32.mrf.mxu1 }
 0x331   : > { %511 = vst [vmem:[%s322_s19] sm:$0xff] %v506_v37 }
 0x332   : > { %v508_v39 = vpop.f32.mrf.mxu1 }
 0x333   : > { %845 = shalt.err (!%p842_p9)
}
 0x334   : > { %s846_s20 = scalar_lea.hbm %s1099_s1, 128  ;;  %s850_s22 = scalar_lea.hbm %s1148_s7, 512 }
 0x335   : > { %p847_p12 = scmp.ne.s32.totalorder %s1099_s1, %s846_s20  ;;  %p851_p13 = scmp.lt.s32.totalorder %s1099_s1, %s1148_s7 }
 0x336   : > { %p852_p4 = scmp.lt.s32.totalorder %s850_s22, %s846_s20 }
 0x337   : > { %p848_p3 = pnand %p847_p12, %p1168_p10 }
 0x338   : > { %p853_p8 = por %p852_p4, %p851_p13 }
 0x339   : > { %p849_p0 = pneg %p848_p3 }
 0x33b   : > { %p854_p5 = pnand %p853_p8, %p849_p0 }
 0x33d   : > { %857 = shalt.err (!%p854_p5)
}
 0x33e   : > { %681 = dma.vmem_to_hbm [thread:$0]  (%p1168_p10), %s1101_s13, 128, %s1099_s1, %s513_s5   ;;  %v670_v40 = vpop.f32.mrf.mxu1 }
 0x33f PF: > { %p703_p1 = scmp.ge.s32.totalorder %s900_s27, 2  ;;  %s538_s15 = sand.u32 1, %s888_s24  }
 0x340   : > { %p1169_p2 = scmp.ne.s32.totalorder %s1156_s8, 0  ;;  %s539_s19 = scalar_lea.sflag [#allocation4], %s538_s15 }
 0x342   : > { %p695_p6 = pnand %p703_p1, %p1169_p2 }
 0x344   : > { %p696_p11 = pneg %p695_p6 }
 0x346   : > { %883 = dma.done.wait (%p696_p11), %s539_s19, 128  }
 0x347   : > { %885 = vsyncadd (%p696_p11), %s539_s19, 4294967168  ;;  %p21_p7 = scmp.ge.s32.totalorder %s1021_s23, 6   ;;  %s1170_s24 = smov %s892_s25 }
 0x348   : > { %s1171_s25 = smov %s896_s26  ;;  %s1172_s26 = smov %s1037_s12 }
 0x349   : > { %s1173_s27 = smov %s1021_s23  ;;  %23 = sbr.rel (!%p21_p7) target bundleno = 9 (0x9), region = 101 }
 0x34e   :  { %544 = vsyncpa [#allocation3], 1 }
 0x34f   :  { %546 = vsyncpa [#allocation3 + $0x1], 1 }
 0x350   :  { %547 = vsyncpa [#allocation6], 1 }
 0x351   :  { %548 = vsyncpa [#allocation4], 1 }
 0x352   :  { %550 = vsyncpa [#allocation4 + $0x1], 1 }

</bundles_post_ra>
